<compile_context>
chip_gen: v7x
topology: tpu7x:2x2x1
jax: 0.10.0
libtpu: 0.0.40
codegen_flags: <defaults>
</compile_context>

<pallas_src>
import functools

import numpy as np

import jax
import jax.numpy as jnp
from jax.experimental import pallas as pl
from jax.experimental.pallas import tpu as pltpu


_BN_EPS = 1e-5
_COMPUTE_DTYPE = jnp.bfloat16  # matmul operand dtype; accumulation is f32


# ----------------------------------------------------------------------------
# Trace-time constants (numpy)
# ----------------------------------------------------------------------------

def _bilinear_matrix(n_in, n_out):
    """Interp matrix M (n_out, n_in): out = M @ in, align_corners=True."""
    m = np.zeros((n_out, n_in), np.float32)
    if n_in == 1:
        m[:, 0] = 1.0
        return m
    src = np.arange(n_out, dtype=np.float64) * (n_in - 1) / (n_out - 1)
    lo = np.clip(np.floor(src).astype(np.int64), 0, n_in - 2)
    frac = (src - lo).astype(np.float32)
    rows = np.arange(n_out)
    m[rows, lo] = 1.0 - frac
    m[rows, lo + 1] = frac
    return m


def _tap_masks(hout, wout):
    """(9, hout*wout) 0/1 masks: validity of each 3x3 tap at each pixel."""
    yy, xx = np.meshgrid(np.arange(hout), np.arange(wout), indexing="ij")
    masks = []
    for ky in range(3):
        for kx in range(3):
            dy, dx = ky - 1, kx - 1
            valid = ((yy + dy >= 0) & (yy + dy < hout) &
                     (xx + dx >= 0) & (xx + dx < wout))
            masks.append(valid.reshape(-1).astype(np.float32))
    return np.stack(masks, axis=0)


# ----------------------------------------------------------------------------
# Fused Pallas kernel (one batch element per grid step)
# ----------------------------------------------------------------------------

def _fused_up_block_kernel(masks_ref, ut_ref, x_ref, pre_ref,
                           wup_ref, sup_ref, bup_ref,
                           w1u_ref, w1p_ref, s1_ref, b1_ref,
                           w2_ref, s2_ref, b2_ref,
                           o_ref, *, shifts):
    f32 = jnp.float32
    masks = masks_ref[...]                             # (9, HW) f32

    def im2col(feat):
        """feat (C, HW) f32 -> (9*C, HW) f32: 9 zero-padded shifted copies."""
        taps = []
        for k, sh in enumerate(shifts):
            t = feat if sh == 0 else pltpu.roll(feat, sh, axis=1)
            taps.append(t * masks[k:k + 1, :])         # kill wrapped/OOB taps
        return jnp.concatenate(taps, axis=0)

    def conv_bn_relu(feats_weights, s_ref, b_ref):
        """Sum of partial 3x3 convs (single K=9*C matmul each) + BN + ReLU."""
        acc = None
        for feat, w_ref in feats_weights:
            w = w_ref[...]                             # (Co, 9*C) bf16
            col = im2col(feat).astype(w.dtype)         # (9*C, HW) bf16
            d = jnp.dot(w, col, preferred_element_type=f32)
            acc = d if acc is None else acc + d
        return jnp.maximum(acc * s_ref[...] + b_ref[...], 0.0)

    # 1) bilinear x2 upsample (align_corners=True) as one MXU matmul
    up = jnp.dot(x_ref[0], ut_ref[...], preferred_element_type=f32)  # (Cin,HW)

    # 2) conv3x3 + BN + ReLU on the upsampled map
    f_up = conv_bn_relu([(up, wup_ref)], sup_ref, bup_ref)           # (prev,HW)

    # 3) channel concat + conv1  ==  sum of two partial convolutions
    pre = pre_ref[0].astype(f32)                                     # (prev,HW)
    y1 = conv_bn_relu([(f_up, w1u_ref), (pre, w1p_ref)], s1_ref, b1_ref)

    # 4) conv2 + BN + ReLU
    y2 = conv_bn_relu([(y1, w2_ref)], s2_ref, b2_ref)                # (Cout,HW)

    o_ref[0] = y2.astype(o_ref.dtype)   # lane-dense store (last dim = H*W)


# ----------------------------------------------------------------------------
# Wrapper
# ----------------------------------------------------------------------------

@jax.jit
def unet_basic_up_block(pre_feature_map, x, raw_params):
    """pre_feature_map: (N, prev, 2H, 2W) NCHW; x: (N, Cin, H, W) NCHW."""
    N, Cin, H, W = x.shape
    Np, prev, Hout, Wout = pre_feature_map.shape
    assert Np == N and Hout == 2 * H and Wout == 2 * W
    HW_in, HW = H * W, Hout * Wout
    Cout = raw_params['conv2']['w'].shape[0]
    cdtype = _COMPUTE_DTYPE

    # ---- trace-time constants ---------------------------------------------
    uh = _bilinear_matrix(H, Hout)                        # (Hout, H)
    uw = _bilinear_matrix(W, Wout)                        # (Wout, W)
    ut = jnp.asarray(np.kron(uh, uw).T, dtype=cdtype)     # (H*W, Hout*Wout)
    masks = jnp.asarray(_tap_masks(Hout, Wout), dtype=jnp.float32)  # (9, HW)
    shifts = tuple(int((-((ky - 1) * Wout + (kx - 1))) % HW)
                   for ky in range(3) for kx in range(3))

    # ---- parameters: folded BN + matmul-layout weights ----------------------
    def fold_bn(p):
        inv = p['gamma'] / jnp.sqrt(p['var'] + _BN_EPS)
        scale = inv.reshape(-1, 1).astype(jnp.float32)
        bias = (p['beta'] + (p['b'] - p['mean']) * inv)
        return scale, bias.reshape(-1, 1).astype(jnp.float32)

    def wmat(w_oihw):
        # (Cout, Cin, 3, 3) -> (Cout, 9*Cin), columns ordered tap-major,
        # channel-minor to match the im2col row order in the kernel.
        o, i = w_oihw.shape[0], w_oihw.shape[1]
        return jnp.transpose(w_oihw, (0, 2, 3, 1)).reshape(o, 9 * i).astype(cdtype)

    wup = wmat(raw_params['up']['w'])
    sup, bup = fold_bn(raw_params['up'])
    w1 = raw_params['conv1']['w']
    w1u, w1p = wmat(w1[:, :prev]), wmat(w1[:, prev:])     # split the concat
    s1, b1 = fold_bn(raw_params['conv1'])
    w2 = wmat(raw_params['conv2']['w'])
    s2, b2 = fold_bn(raw_params['conv2'])

    # ---- kernel inputs: bf16 activations, spatially flattened (free reshape)
    x_k = x.astype(cdtype).reshape(N, Cin, HW_in)
    pre_k = pre_feature_map.astype(cdtype).reshape(N, prev, HW)

    def const_spec(arr):
        zeros = (0,) * arr.ndim
        return pl.BlockSpec(arr.shape, lambda n: zeros)

    out = pl.pallas_call(
        functools.partial(_fused_up_block_kernel, shifts=shifts),
        out_shape=jax.ShapeDtypeStruct((N, Cout, HW), jnp.float32),
        grid=(N,),
        in_specs=[
            const_spec(masks),
            const_spec(ut),
            pl.BlockSpec((1, Cin, HW_in), lambda n: (n, 0, 0)),
            pl.BlockSpec((1, prev, HW), lambda n: (n, 0, 0)),
            const_spec(wup), const_spec(sup), const_spec(bup),
            const_spec(w1u), const_spec(w1p), const_spec(s1), const_spec(b1),
            const_spec(w2), const_spec(s2), const_spec(b2),
        ],
        out_specs=pl.BlockSpec((1, Cout, HW), lambda n: (n, 0, 0)),
        compiler_params=pltpu.CompilerParams(
            dimension_semantics=("parallel",)),
    )(masks, ut, x_k, pre_k, wup, sup, bup, w1u, w1p, s1, b1, w2, s2, b2)

    # already channel-first: just unflatten the spatial dim -> NCHW
    return out.reshape(N, Cout, Hout, Wout)


# ----------------------------------------------------------------------------
# Parameters (deterministic, shapes follow the nn.Module __init__)
# ----------------------------------------------------------------------------

def make_raw_params(key, input_channel, prev_channel, output_channel):
    def conv_params(k, cout, cin):
        kw, kb = jax.random.split(k)
        w = jax.random.normal(kw, (cout, cin, 3, 3), jnp.float32) / np.sqrt(cin * 9)
        b = 0.1 * jax.random.normal(kb, (cout,), jnp.float32)
        return w, b

    def bn_params(k, c):
        k1, k2, k3, k4 = jax.random.split(k, 4)
        return dict(gamma=1.0 + 0.1 * jax.random.normal(k1, (c,), jnp.float32),
                    beta=0.1 * jax.random.normal(k2, (c,), jnp.float32),
                    mean=0.1 * jax.random.normal(k3, (c,), jnp.float32),
                    var=1.0 + 0.1 * jax.random.uniform(k4, (c,), jnp.float32))

    ks = jax.random.split(key, 6)
    w, b = conv_params(ks[0], prev_channel, input_channel)
    up = dict(w=w, b=b, **bn_params(ks[1], prev_channel))
    w, b = conv_params(ks[2], output_channel, 2 * prev_channel)
    c1 = dict(w=w, b=b, **bn_params(ks[3], output_channel))
    w, b = conv_params(ks[4], output_channel, output_channel)
    c2 = dict(w=w, b=b, **bn_params(ks[5], output_channel))
    return dict(up=up, conv1=c1, conv2=c2)


# ----------------------------------------------------------------------------
# Pure-XLA reference (mirrors the kernel's bf16 operand precision)
# ----------------------------------------------------------------------------

def _reference_forward(pre_feature_map, x, raw, compute_dtype):
    f32 = jnp.float32
    cast = lambda a: a.astype(compute_dtype).astype(f32)
    N, Cin, H, W = x.shape
    Hout, Wout = 2 * H, 2 * W

    uh = cast(jnp.asarray(_bilinear_matrix(H, Hout)))   # (Hout, H)
    uw = cast(jnp.asarray(_bilinear_matrix(W, Wout)))   # (Wout, W)
    xb = cast(x)
    up = jnp.einsum('nchw,uw->nchu', xb, uw)
    up = jnp.einsum('vh,nchu->ncvu', uh, up)

    def conv_bn_relu(inp, p):
        y = jax.lax.conv_general_dilated(
            cast(inp), cast(p['w']), window_strides=(1, 1),
            padding=((1, 1), (1, 1)),
            dimension_numbers=('NCHW', 'OIHW', 'NCHW'))
        y = y + p['b'][None, :, None, None]
        inv = p['gamma'] / jnp.sqrt(p['var'] + _BN_EPS)
        y = (y - p['mean'][None, :, None, None]) * inv[None, :, None, None] \
            + p['beta'][None, :, None, None]
        return jnp.maximum(y, 0.0)

    f_up = conv_bn_relu(up, raw['up'])
    cat = jnp.concatenate([f_up, cast(pre_feature_map)], axis=1)
    y1 = conv_bn_relu(cat, raw['conv1'])
    y2 = conv_bn_relu(y1, raw['conv2'])
    return y2


# ----------------------------------------------------------------------------
# Demo / self-check
# ----------------------------------------------------------------------------

if __name__ == "__main__":
    # Module config: input_channel=8, prev_channel=8, output_channel=8
    N, Cin, prev, Cout = 2, 8, 8, 8
    H = W = 8

    key = jax.random.PRNGKey(0)
    kx, kp, kparams = jax.random.split(key, 3)
    x = jax.random.normal(kx, (N, Cin, H, W), jnp.float32)
    pre_feature_map = jax.random.normal(kp, (N, prev, 2 * H, 2 * W), jnp.float32)
    raw = make_raw_params(kparams, Cin, prev, Cout)

    out = jax.block_until_ready(unet_basic_up_block(pre_feature_map, x, raw))
    assert out.shape == (N, Cout, 2 * H, 2 * W), out.shape
    assert bool(jnp.all(out >= 0.0))  # final ReLU

    # Numerical check vs. plain-XLA reference using the same bf16 operand
    # precision (expected max |diff| ~1e-2 from bf16 rounding / op ordering).
    ref = _reference_forward(pre_feature_map, x, raw, _COMPUTE_DTYPE)
    assert bool(jnp.allclose(out, ref, rtol=1e-1, atol=1e-1)), \
        float(jnp.max(jnp.abs(out - ref)))

    print("KERNEL_OK")
</pallas_src>

<mosaic_0001>
module attributes {stable_mosaic.version = 11 : i64} {
  func.func @_fused_up_block_kernel(%arg0: i32, %arg1: memref<9x256xf32, #tpu.memory_space<vmem>>, %arg2: memref<64x256xbf16, #tpu.memory_space<vmem>>, %arg3: memref<1x8x64xbf16, #tpu.memory_space<vmem>>, %arg4: memref<1x8x256xbf16, #tpu.memory_space<vmem>>, %arg5: memref<8x72xbf16, #tpu.memory_space<vmem>>, %arg6: memref<8x1xf32, #tpu.memory_space<vmem>>, %arg7: memref<8x1xf32, #tpu.memory_space<vmem>>, %arg8: memref<8x72xbf16, #tpu.memory_space<vmem>>, %arg9: memref<8x72xbf16, #tpu.memory_space<vmem>>, %arg10: memref<8x1xf32, #tpu.memory_space<vmem>>, %arg11: memref<8x1xf32, #tpu.memory_space<vmem>>, %arg12: memref<8x72xbf16, #tpu.memory_space<vmem>>, %arg13: memref<8x1xf32, #tpu.memory_space<vmem>>, %arg14: memref<8x1xf32, #tpu.memory_space<vmem>>, %arg15: memref<1x8x256xf32, #tpu.memory_space<vmem>>) attributes {dimension_semantics = [#tpu.dimension_semantics<parallel>], iteration_bounds = array<i64: 2>, scalar_prefetch = 0 : i64, scratch_operands = 0 : i64, tpu.core_type = #tpu.core_type<tc>, window_params = [{pipeline_mode = #tpu.pipeline_mode<synchronous>, transform_indices = @transform_0, window_bounds = array<i64: 9, 256>}, {pipeline_mode = #tpu.pipeline_mode<synchronous>, transform_indices = @transform_1, window_bounds = array<i64: 64, 256>}, {transform_indices = @transform_2, window_bounds = array<i64: 1, 8, 64>}, {transform_indices = @transform_3, window_bounds = array<i64: 1, 8, 256>}, {pipeline_mode = #tpu.pipeline_mode<synchronous>, transform_indices = @transform_4, window_bounds = array<i64: 8, 72>}, {pipeline_mode = #tpu.pipeline_mode<synchronous>, transform_indices = @transform_5, window_bounds = array<i64: 8, 1>}, {pipeline_mode = #tpu.pipeline_mode<synchronous>, transform_indices = @transform_6, window_bounds = array<i64: 8, 1>}, {pipeline_mode = #tpu.pipeline_mode<synchronous>, transform_indices = @transform_7, window_bounds = array<i64: 8, 72>}, {pipeline_mode = #tpu.pipeline_mode<synchronous>, transform_indices = @transform_8, window_bounds = array<i64: 8, 72>}, {pipeline_mode = #tpu.pipeline_mode<synchronous>, transform_indices = @transform_9, window_bounds = array<i64: 8, 1>}, {pipeline_mode = #tpu.pipeline_mode<synchronous>, transform_indices = @transform_10, window_bounds = array<i64: 8, 1>}, {pipeline_mode = #tpu.pipeline_mode<synchronous>, transform_indices = @transform_11, window_bounds = array<i64: 8, 72>}, {pipeline_mode = #tpu.pipeline_mode<synchronous>, transform_indices = @transform_12, window_bounds = array<i64: 8, 1>}, {pipeline_mode = #tpu.pipeline_mode<synchronous>, transform_indices = @transform_13, window_bounds = array<i64: 8, 1>}, {transform_indices = @transform_14, window_bounds = array<i64: 1, 8, 256>}]} {
    %c0 = arith.constant 0 : index
    %c0_0 = arith.constant 0 : index
    %0 = vector.load %arg1[%c0, %c0_0] : memref<9x256xf32, #tpu.memory_space<vmem>>, vector<9x256xf32>
    %c0_1 = arith.constant 0 : index
    %c0_2 = arith.constant 0 : index
    %c0_3 = arith.constant 0 : index
    %1 = vector.load %arg3[%c0_1, %c0_2, %c0_3] : memref<1x8x64xbf16, #tpu.memory_space<vmem>>, vector<1x8x64xbf16>
    %2 = vector.shape_cast %1 : vector<1x8x64xbf16> to vector<8x64xbf16>
    %c0_4 = arith.constant 0 : index
    %c0_5 = arith.constant 0 : index
    %3 = vector.load %arg2[%c0_4, %c0_5] : memref<64x256xbf16, #tpu.memory_space<vmem>>, vector<64x256xbf16>
    %cst = arith.constant dense<0.000000e+00> : vector<8x256xf32>
    %4 = tpu.matmul %2, %3, %cst {dimension_numbers = #tpu.dot_dimension_numbers<[1], [0], [0], [1], [0, 0, 1, 1], [], []>} : vector<8x64xbf16>, vector<64x256xbf16>, vector<8x256xf32> -> vector<8x256xf32>
    %c0_6 = arith.constant 0 : index
    %c0_7 = arith.constant 0 : index
    %5 = vector.load %arg5[%c0_6, %c0_7] : memref<8x72xbf16, #tpu.memory_space<vmem>>, vector<8x72xbf16>
    %c17_i32 = arith.constant 17 : i32
    %6 = tpu.dynamic_rotate %4 by %c17_i32 dim 1 : vector<8x256xf32>, i32 -> vector<8x256xf32>
    %7 = vector.extract_strided_slice %0 {offsets = [0, 0], sizes = [1, 256], strides = [1, 1]} : vector<9x256xf32> to vector<1x256xf32>
    %8 = vector.broadcast %7 : vector<1x256xf32> to vector<8x256xf32>
    %9 = arith.mulf %6, %8 : vector<8x256xf32>
    %c16_i32 = arith.constant 16 : i32
    %10 = tpu.dynamic_rotate %4 by %c16_i32 dim 1 : vector<8x256xf32>, i32 -> vector<8x256xf32>
    %11 = vector.extract_strided_slice %0 {offsets = [1, 0], sizes = [1, 256], strides = [1, 1]} : vector<9x256xf32> to vector<1x256xf32>
    %12 = vector.broadcast %11 : vector<1x256xf32> to vector<8x256xf32>
    %13 = arith.mulf %10, %12 : vector<8x256xf32>
    %c15_i32 = arith.constant 15 : i32
    %14 = tpu.dynamic_rotate %4 by %c15_i32 dim 1 : vector<8x256xf32>, i32 -> vector<8x256xf32>
    %15 = vector.extract_strided_slice %0 {offsets = [2, 0], sizes = [1, 256], strides = [1, 1]} : vector<9x256xf32> to vector<1x256xf32>
    %16 = vector.broadcast %15 : vector<1x256xf32> to vector<8x256xf32>
    %17 = arith.mulf %14, %16 : vector<8x256xf32>
    %c1_i32 = arith.constant 1 : i32
    %18 = tpu.dynamic_rotate %4 by %c1_i32 dim 1 : vector<8x256xf32>, i32 -> vector<8x256xf32>
    %19 = vector.extract_strided_slice %0 {offsets = [3, 0], sizes = [1, 256], strides = [1, 1]} : vector<9x256xf32> to vector<1x256xf32>
    %20 = vector.broadcast %19 : vector<1x256xf32> to vector<8x256xf32>
    %21 = arith.mulf %18, %20 : vector<8x256xf32>
    %22 = vector.extract_strided_slice %0 {offsets = [4, 0], sizes = [1, 256], strides = [1, 1]} : vector<9x256xf32> to vector<1x256xf32>
    %23 = vector.broadcast %22 : vector<1x256xf32> to vector<8x256xf32>
    %24 = arith.mulf %4, %23 : vector<8x256xf32>
    %c255_i32 = arith.constant 255 : i32
    %25 = tpu.dynamic_rotate %4 by %c255_i32 dim 1 : vector<8x256xf32>, i32 -> vector<8x256xf32>
    %26 = vector.extract_strided_slice %0 {offsets = [5, 0], sizes = [1, 256], strides = [1, 1]} : vector<9x256xf32> to vector<1x256xf32>
    %27 = vector.broadcast %26 : vector<1x256xf32> to vector<8x256xf32>
    %28 = arith.mulf %25, %27 : vector<8x256xf32>
    %c241_i32 = arith.constant 241 : i32
    %29 = tpu.dynamic_rotate %4 by %c241_i32 dim 1 : vector<8x256xf32>, i32 -> vector<8x256xf32>
    %30 = vector.extract_strided_slice %0 {offsets = [6, 0], sizes = [1, 256], strides = [1, 1]} : vector<9x256xf32> to vector<1x256xf32>
    %31 = vector.broadcast %30 : vector<1x256xf32> to vector<8x256xf32>
    %32 = arith.mulf %29, %31 : vector<8x256xf32>
    %c240_i32 = arith.constant 240 : i32
    %33 = tpu.dynamic_rotate %4 by %c240_i32 dim 1 : vector<8x256xf32>, i32 -> vector<8x256xf32>
    %34 = vector.extract_strided_slice %0 {offsets = [7, 0], sizes = [1, 256], strides = [1, 1]} : vector<9x256xf32> to vector<1x256xf32>
    %35 = vector.broadcast %34 : vector<1x256xf32> to vector<8x256xf32>
    %36 = arith.mulf %33, %35 : vector<8x256xf32>
    %c239_i32 = arith.constant 239 : i32
    %37 = tpu.dynamic_rotate %4 by %c239_i32 dim 1 : vector<8x256xf32>, i32 -> vector<8x256xf32>
    %38 = vector.extract_strided_slice %0 {offsets = [8, 0], sizes = [1, 256], strides = [1, 1]} : vector<9x256xf32> to vector<1x256xf32>
    %39 = vector.broadcast %38 : vector<1x256xf32> to vector<8x256xf32>
    %40 = arith.mulf %37, %39 : vector<8x256xf32>
    %41 = tpu.concatenate %9, %13, %17, %21, %24, %28, %32, %36, %40 in 0 : vector<8x256xf32>, vector<8x256xf32>, vector<8x256xf32>, vector<8x256xf32>, vector<8x256xf32>, vector<8x256xf32>, vector<8x256xf32>, vector<8x256xf32>, vector<8x256xf32> -> vector<72x256xf32>
    %42 = arith.truncf %41 : vector<72x256xf32> to vector<72x256xbf16>
    %cst_8 = arith.constant dense<0.000000e+00> : vector<8x256xf32>
    %43 = tpu.matmul %5, %42, %cst_8 {dimension_numbers = #tpu.dot_dimension_numbers<[1], [0], [0], [1], [0, 0, 1, 1], [], []>} : vector<8x72xbf16>, vector<72x256xbf16>, vector<8x256xf32> -> vector<8x256xf32>
    %c0_9 = arith.constant 0 : index
    %c0_10 = arith.constant 0 : index
    %44 = vector.load %arg6[%c0_9, %c0_10] : memref<8x1xf32, #tpu.memory_space<vmem>>, vector<8x1xf32>
    %45 = vector.broadcast %44 : vector<8x1xf32> to vector<8x256xf32>
    %46 = arith.mulf %43, %45 : vector<8x256xf32>
    %c0_11 = arith.constant 0 : index
    %c0_12 = arith.constant 0 : index
    %47 = vector.load %arg7[%c0_11, %c0_12] : memref<8x1xf32, #tpu.memory_space<vmem>>, vector<8x1xf32>
    %48 = vector.broadcast %47 : vector<8x1xf32> to vector<8x256xf32>
    %49 = arith.addf %46, %48 : vector<8x256xf32>
    %cst_13 = arith.constant 0.000000e+00 : f32
    %50 = vector.broadcast %cst_13 : f32 to vector<8x256xf32>
    %51 = arith.maximumf %49, %50 : vector<8x256xf32>
    %c0_14 = arith.constant 0 : index
    %c0_15 = arith.constant 0 : index
    %c0_16 = arith.constant 0 : index
    %52 = vector.load %arg4[%c0_14, %c0_15, %c0_16] : memref<1x8x256xbf16, #tpu.memory_space<vmem>>, vector<1x8x256xbf16>
    %53 = vector.shape_cast %52 : vector<1x8x256xbf16> to vector<8x256xbf16>
    %54 = arith.extf %53 : vector<8x256xbf16> to vector<8x256xf32>
    %c0_17 = arith.constant 0 : index
    %c0_18 = arith.constant 0 : index
    %55 = vector.load %arg8[%c0_17, %c0_18] : memref<8x72xbf16, #tpu.memory_space<vmem>>, vector<8x72xbf16>
    %c17_i32_19 = arith.constant 17 : i32
    %56 = tpu.dynamic_rotate %51 by %c17_i32_19 dim 1 : vector<8x256xf32>, i32 -> vector<8x256xf32>
    %57 = vector.extract_strided_slice %0 {offsets = [0, 0], sizes = [1, 256], strides = [1, 1]} : vector<9x256xf32> to vector<1x256xf32>
    %58 = vector.broadcast %57 : vector<1x256xf32> to vector<8x256xf32>
    %59 = arith.mulf %56, %58 : vector<8x256xf32>
    %c16_i32_20 = arith.constant 16 : i32
    %60 = tpu.dynamic_rotate %51 by %c16_i32_20 dim 1 : vector<8x256xf32>, i32 -> vector<8x256xf32>
    %61 = vector.extract_strided_slice %0 {offsets = [1, 0], sizes = [1, 256], strides = [1, 1]} : vector<9x256xf32> to vector<1x256xf32>
    %62 = vector.broadcast %61 : vector<1x256xf32> to vector<8x256xf32>
    %63 = arith.mulf %60, %62 : vector<8x256xf32>
    %c15_i32_21 = arith.constant 15 : i32
    %64 = tpu.dynamic_rotate %51 by %c15_i32_21 dim 1 : vector<8x256xf32>, i32 -> vector<8x256xf32>
    %65 = vector.extract_strided_slice %0 {offsets = [2, 0], sizes = [1, 256], strides = [1, 1]} : vector<9x256xf32> to vector<1x256xf32>
    %66 = vector.broadcast %65 : vector<1x256xf32> to vector<8x256xf32>
    %67 = arith.mulf %64, %66 : vector<8x256xf32>
    %c1_i32_22 = arith.constant 1 : i32
    %68 = tpu.dynamic_rotate %51 by %c1_i32_22 dim 1 : vector<8x256xf32>, i32 -> vector<8x256xf32>
    %69 = vector.extract_strided_slice %0 {offsets = [3, 0], sizes = [1, 256], strides = [1, 1]} : vector<9x256xf32> to vector<1x256xf32>
    %70 = vector.broadcast %69 : vector<1x256xf32> to vector<8x256xf32>
    %71 = arith.mulf %68, %70 : vector<8x256xf32>
    %72 = vector.extract_strided_slice %0 {offsets = [4, 0], sizes = [1, 256], strides = [1, 1]} : vector<9x256xf32> to vector<1x256xf32>
    %73 = vector.broadcast %72 : vector<1x256xf32> to vector<8x256xf32>
    %74 = arith.mulf %51, %73 : vector<8x256xf32>
    %c255_i32_23 = arith.constant 255 : i32
    %75 = tpu.dynamic_rotate %51 by %c255_i32_23 dim 1 : vector<8x256xf32>, i32 -> vector<8x256xf32>
    %76 = vector.extract_strided_slice %0 {offsets = [5, 0], sizes = [1, 256], strides = [1, 1]} : vector<9x256xf32> to vector<1x256xf32>
    %77 = vector.broadcast %76 : vector<1x256xf32> to vector<8x256xf32>
    %78 = arith.mulf %75, %77 : vector<8x256xf32>
    %c241_i32_24 = arith.constant 241 : i32
    %79 = tpu.dynamic_rotate %51 by %c241_i32_24 dim 1 : vector<8x256xf32>, i32 -> vector<8x256xf32>
    %80 = vector.extract_strided_slice %0 {offsets = [6, 0], sizes = [1, 256], strides = [1, 1]} : vector<9x256xf32> to vector<1x256xf32>
    %81 = vector.broadcast %80 : vector<1x256xf32> to vector<8x256xf32>
    %82 = arith.mulf %79, %81 : vector<8x256xf32>
    %c240_i32_25 = arith.constant 240 : i32
    %83 = tpu.dynamic_rotate %51 by %c240_i32_25 dim 1 : vector<8x256xf32>, i32 -> vector<8x256xf32>
    %84 = vector.extract_strided_slice %0 {offsets = [7, 0], sizes = [1, 256], strides = [1, 1]} : vector<9x256xf32> to vector<1x256xf32>
    %85 = vector.broadcast %84 : vector<1x256xf32> to vector<8x256xf32>
    %86 = arith.mulf %83, %85 : vector<8x256xf32>
    %c239_i32_26 = arith.constant 239 : i32
    %87 = tpu.dynamic_rotate %51 by %c239_i32_26 dim 1 : vector<8x256xf32>, i32 -> vector<8x256xf32>
    %88 = vector.extract_strided_slice %0 {offsets = [8, 0], sizes = [1, 256], strides = [1, 1]} : vector<9x256xf32> to vector<1x256xf32>
    %89 = vector.broadcast %88 : vector<1x256xf32> to vector<8x256xf32>
    %90 = arith.mulf %87, %89 : vector<8x256xf32>
    %91 = tpu.concatenate %59, %63, %67, %71, %74, %78, %82, %86, %90 in 0 : vector<8x256xf32>, vector<8x256xf32>, vector<8x256xf32>, vector<8x256xf32>, vector<8x256xf32>, vector<8x256xf32>, vector<8x256xf32>, vector<8x256xf32>, vector<8x256xf32> -> vector<72x256xf32>
    %92 = arith.truncf %91 : vector<72x256xf32> to vector<72x256xbf16>
    %cst_27 = arith.constant dense<0.000000e+00> : vector<8x256xf32>
    %93 = tpu.matmul %55, %92, %cst_27 {dimension_numbers = #tpu.dot_dimension_numbers<[1], [0], [0], [1], [0, 0, 1, 1], [], []>} : vector<8x72xbf16>, vector<72x256xbf16>, vector<8x256xf32> -> vector<8x256xf32>
    %c0_28 = arith.constant 0 : index
    %c0_29 = arith.constant 0 : index
    %94 = vector.load %arg9[%c0_28, %c0_29] : memref<8x72xbf16, #tpu.memory_space<vmem>>, vector<8x72xbf16>
    %c17_i32_30 = arith.constant 17 : i32
    %95 = tpu.dynamic_rotate %54 by %c17_i32_30 dim 1 : vector<8x256xf32>, i32 -> vector<8x256xf32>
    %96 = vector.extract_strided_slice %0 {offsets = [0, 0], sizes = [1, 256], strides = [1, 1]} : vector<9x256xf32> to vector<1x256xf32>
    %97 = vector.broadcast %96 : vector<1x256xf32> to vector<8x256xf32>
    %98 = arith.mulf %95, %97 : vector<8x256xf32>
    %c16_i32_31 = arith.constant 16 : i32
    %99 = tpu.dynamic_rotate %54 by %c16_i32_31 dim 1 : vector<8x256xf32>, i32 -> vector<8x256xf32>
    %100 = vector.extract_strided_slice %0 {offsets = [1, 0], sizes = [1, 256], strides = [1, 1]} : vector<9x256xf32> to vector<1x256xf32>
    %101 = vector.broadcast %100 : vector<1x256xf32> to vector<8x256xf32>
    %102 = arith.mulf %99, %101 : vector<8x256xf32>
    %c15_i32_32 = arith.constant 15 : i32
    %103 = tpu.dynamic_rotate %54 by %c15_i32_32 dim 1 : vector<8x256xf32>, i32 -> vector<8x256xf32>
    %104 = vector.extract_strided_slice %0 {offsets = [2, 0], sizes = [1, 256], strides = [1, 1]} : vector<9x256xf32> to vector<1x256xf32>
    %105 = vector.broadcast %104 : vector<1x256xf32> to vector<8x256xf32>
    %106 = arith.mulf %103, %105 : vector<8x256xf32>
    %c1_i32_33 = arith.constant 1 : i32
    %107 = tpu.dynamic_rotate %54 by %c1_i32_33 dim 1 : vector<8x256xf32>, i32 -> vector<8x256xf32>
    %108 = vector.extract_strided_slice %0 {offsets = [3, 0], sizes = [1, 256], strides = [1, 1]} : vector<9x256xf32> to vector<1x256xf32>
    %109 = vector.broadcast %108 : vector<1x256xf32> to vector<8x256xf32>
    %110 = arith.mulf %107, %109 : vector<8x256xf32>
    %111 = vector.extract_strided_slice %0 {offsets = [4, 0], sizes = [1, 256], strides = [1, 1]} : vector<9x256xf32> to vector<1x256xf32>
    %112 = vector.broadcast %111 : vector<1x256xf32> to vector<8x256xf32>
    %113 = arith.mulf %54, %112 : vector<8x256xf32>
    %c255_i32_34 = arith.constant 255 : i32
    %114 = tpu.dynamic_rotate %54 by %c255_i32_34 dim 1 : vector<8x256xf32>, i32 -> vector<8x256xf32>
    %115 = vector.extract_strided_slice %0 {offsets = [5, 0], sizes = [1, 256], strides = [1, 1]} : vector<9x256xf32> to vector<1x256xf32>
    %116 = vector.broadcast %115 : vector<1x256xf32> to vector<8x256xf32>
    %117 = arith.mulf %114, %116 : vector<8x256xf32>
    %c241_i32_35 = arith.constant 241 : i32
    %118 = tpu.dynamic_rotate %54 by %c241_i32_35 dim 1 : vector<8x256xf32>, i32 -> vector<8x256xf32>
    %119 = vector.extract_strided_slice %0 {offsets = [6, 0], sizes = [1, 256], strides = [1, 1]} : vector<9x256xf32> to vector<1x256xf32>
    %120 = vector.broadcast %119 : vector<1x256xf32> to vector<8x256xf32>
    %121 = arith.mulf %118, %120 : vector<8x256xf32>
    %c240_i32_36 = arith.constant 240 : i32
    %122 = tpu.dynamic_rotate %54 by %c240_i32_36 dim 1 : vector<8x256xf32>, i32 -> vector<8x256xf32>
    %123 = vector.extract_strided_slice %0 {offsets = [7, 0], sizes = [1, 256], strides = [1, 1]} : vector<9x256xf32> to vector<1x256xf32>
    %124 = vector.broadcast %123 : vector<1x256xf32> to vector<8x256xf32>
    %125 = arith.mulf %122, %124 : vector<8x256xf32>
    %c239_i32_37 = arith.constant 239 : i32
    %126 = tpu.dynamic_rotate %54 by %c239_i32_37 dim 1 : vector<8x256xf32>, i32 -> vector<8x256xf32>
    %127 = vector.extract_strided_slice %0 {offsets = [8, 0], sizes = [1, 256], strides = [1, 1]} : vector<9x256xf32> to vector<1x256xf32>
    %128 = vector.broadcast %127 : vector<1x256xf32> to vector<8x256xf32>
    %129 = arith.mulf %126, %128 : vector<8x256xf32>
    %130 = tpu.concatenate %98, %102, %106, %110, %113, %117, %121, %125, %129 in 0 : vector<8x256xf32>, vector<8x256xf32>, vector<8x256xf32>, vector<8x256xf32>, vector<8x256xf32>, vector<8x256xf32>, vector<8x256xf32>, vector<8x256xf32>, vector<8x256xf32> -> vector<72x256xf32>
    %131 = arith.truncf %130 : vector<72x256xf32> to vector<72x256xbf16>
    %cst_38 = arith.constant dense<0.000000e+00> : vector<8x256xf32>
    %132 = tpu.matmul %94, %131, %cst_38 {dimension_numbers = #tpu.dot_dimension_numbers<[1], [0], [0], [1], [0, 0, 1, 1], [], []>} : vector<8x72xbf16>, vector<72x256xbf16>, vector<8x256xf32> -> vector<8x256xf32>
    %133 = arith.addf %93, %132 : vector<8x256xf32>
    %c0_39 = arith.constant 0 : index
    %c0_40 = arith.constant 0 : index
    %134 = vector.load %arg10[%c0_39, %c0_40] : memref<8x1xf32, #tpu.memory_space<vmem>>, vector<8x1xf32>
    %135 = vector.broadcast %134 : vector<8x1xf32> to vector<8x256xf32>
    %136 = arith.mulf %133, %135 : vector<8x256xf32>
    %c0_41 = arith.constant 0 : index
    %c0_42 = arith.constant 0 : index
    %137 = vector.load %arg11[%c0_41, %c0_42] : memref<8x1xf32, #tpu.memory_space<vmem>>, vector<8x1xf32>
    %138 = vector.broadcast %137 : vector<8x1xf32> to vector<8x256xf32>
    %139 = arith.addf %136, %138 : vector<8x256xf32>
    %cst_43 = arith.constant 0.000000e+00 : f32
    %140 = vector.broadcast %cst_43 : f32 to vector<8x256xf32>
    %141 = arith.maximumf %139, %140 : vector<8x256xf32>
    %c0_44 = arith.constant 0 : index
    %c0_45 = arith.constant 0 : index
    %142 = vector.load %arg12[%c0_44, %c0_45] : memref<8x72xbf16, #tpu.memory_space<vmem>>, vector<8x72xbf16>
    %c17_i32_46 = arith.constant 17 : i32
    %143 = tpu.dynamic_rotate %141 by %c17_i32_46 dim 1 : vector<8x256xf32>, i32 -> vector<8x256xf32>
    %144 = vector.extract_strided_slice %0 {offsets = [0, 0], sizes = [1, 256], strides = [1, 1]} : vector<9x256xf32> to vector<1x256xf32>
    %145 = vector.broadcast %144 : vector<1x256xf32> to vector<8x256xf32>
    %146 = arith.mulf %143, %145 : vector<8x256xf32>
    %c16_i32_47 = arith.constant 16 : i32
    %147 = tpu.dynamic_rotate %141 by %c16_i32_47 dim 1 : vector<8x256xf32>, i32 -> vector<8x256xf32>
    %148 = vector.extract_strided_slice %0 {offsets = [1, 0], sizes = [1, 256], strides = [1, 1]} : vector<9x256xf32> to vector<1x256xf32>
    %149 = vector.broadcast %148 : vector<1x256xf32> to vector<8x256xf32>
    %150 = arith.mulf %147, %149 : vector<8x256xf32>
    %c15_i32_48 = arith.constant 15 : i32
    %151 = tpu.dynamic_rotate %141 by %c15_i32_48 dim 1 : vector<8x256xf32>, i32 -> vector<8x256xf32>
    %152 = vector.extract_strided_slice %0 {offsets = [2, 0], sizes = [1, 256], strides = [1, 1]} : vector<9x256xf32> to vector<1x256xf32>
    %153 = vector.broadcast %152 : vector<1x256xf32> to vector<8x256xf32>
    %154 = arith.mulf %151, %153 : vector<8x256xf32>
    %c1_i32_49 = arith.constant 1 : i32
    %155 = tpu.dynamic_rotate %141 by %c1_i32_49 dim 1 : vector<8x256xf32>, i32 -> vector<8x256xf32>
    %156 = vector.extract_strided_slice %0 {offsets = [3, 0], sizes = [1, 256], strides = [1, 1]} : vector<9x256xf32> to vector<1x256xf32>
    %157 = vector.broadcast %156 : vector<1x256xf32> to vector<8x256xf32>
    %158 = arith.mulf %155, %157 : vector<8x256xf32>
    %159 = vector.extract_strided_slice %0 {offsets = [4, 0], sizes = [1, 256], strides = [1, 1]} : vector<9x256xf32> to vector<1x256xf32>
    %160 = vector.broadcast %159 : vector<1x256xf32> to vector<8x256xf32>
    %161 = arith.mulf %141, %160 : vector<8x256xf32>
    %c255_i32_50 = arith.constant 255 : i32
    %162 = tpu.dynamic_rotate %141 by %c255_i32_50 dim 1 : vector<8x256xf32>, i32 -> vector<8x256xf32>
    %163 = vector.extract_strided_slice %0 {offsets = [5, 0], sizes = [1, 256], strides = [1, 1]} : vector<9x256xf32> to vector<1x256xf32>
    %164 = vector.broadcast %163 : vector<1x256xf32> to vector<8x256xf32>
    %165 = arith.mulf %162, %164 : vector<8x256xf32>
    %c241_i32_51 = arith.constant 241 : i32
    %166 = tpu.dynamic_rotate %141 by %c241_i32_51 dim 1 : vector<8x256xf32>, i32 -> vector<8x256xf32>
    %167 = vector.extract_strided_slice %0 {offsets = [6, 0], sizes = [1, 256], strides = [1, 1]} : vector<9x256xf32> to vector<1x256xf32>
    %168 = vector.broadcast %167 : vector<1x256xf32> to vector<8x256xf32>
    %169 = arith.mulf %166, %168 : vector<8x256xf32>
    %c240_i32_52 = arith.constant 240 : i32
    %170 = tpu.dynamic_rotate %141 by %c240_i32_52 dim 1 : vector<8x256xf32>, i32 -> vector<8x256xf32>
    %171 = vector.extract_strided_slice %0 {offsets = [7, 0], sizes = [1, 256], strides = [1, 1]} : vector<9x256xf32> to vector<1x256xf32>
    %172 = vector.broadcast %171 : vector<1x256xf32> to vector<8x256xf32>
    %173 = arith.mulf %170, %172 : vector<8x256xf32>
    %c239_i32_53 = arith.constant 239 : i32
    %174 = tpu.dynamic_rotate %141 by %c239_i32_53 dim 1 : vector<8x256xf32>, i32 -> vector<8x256xf32>
    %175 = vector.extract_strided_slice %0 {offsets = [8, 0], sizes = [1, 256], strides = [1, 1]} : vector<9x256xf32> to vector<1x256xf32>
    %176 = vector.broadcast %175 : vector<1x256xf32> to vector<8x256xf32>
    %177 = arith.mulf %174, %176 : vector<8x256xf32>
    %178 = tpu.concatenate %146, %150, %154, %158, %161, %165, %169, %173, %177 in 0 : vector<8x256xf32>, vector<8x256xf32>, vector<8x256xf32>, vector<8x256xf32>, vector<8x256xf32>, vector<8x256xf32>, vector<8x256xf32>, vector<8x256xf32>, vector<8x256xf32> -> vector<72x256xf32>
    %179 = arith.truncf %178 : vector<72x256xf32> to vector<72x256xbf16>
    %cst_54 = arith.constant dense<0.000000e+00> : vector<8x256xf32>
    %180 = tpu.matmul %142, %179, %cst_54 {dimension_numbers = #tpu.dot_dimension_numbers<[1], [0], [0], [1], [0, 0, 1, 1], [], []>} : vector<8x72xbf16>, vector<72x256xbf16>, vector<8x256xf32> -> vector<8x256xf32>
    %c0_55 = arith.constant 0 : index
    %c0_56 = arith.constant 0 : index
    %181 = vector.load %arg13[%c0_55, %c0_56] : memref<8x1xf32, #tpu.memory_space<vmem>>, vector<8x1xf32>
    %182 = vector.broadcast %181 : vector<8x1xf32> to vector<8x256xf32>
    %183 = arith.mulf %180, %182 : vector<8x256xf32>
    %c0_57 = arith.constant 0 : index
    %c0_58 = arith.constant 0 : index
    %184 = vector.load %arg14[%c0_57, %c0_58] : memref<8x1xf32, #tpu.memory_space<vmem>>, vector<8x1xf32>
    %185 = vector.broadcast %184 : vector<8x1xf32> to vector<8x256xf32>
    %186 = arith.addf %183, %185 : vector<8x256xf32>
    %cst_59 = arith.constant 0.000000e+00 : f32
    %187 = vector.broadcast %cst_59 : f32 to vector<8x256xf32>
    %188 = arith.maximumf %186, %187 : vector<8x256xf32>
    %c0_60 = arith.constant 0 : index
    %c0_61 = arith.constant 0 : index
    %c0_62 = arith.constant 0 : index
    %189 = vector.load %arg15[%c0_60, %c0_61, %c0_62] : memref<1x8x256xf32, #tpu.memory_space<vmem>>, vector<1x8x256xf32>
    %190 = vector.shape_cast %189 : vector<1x8x256xf32> to vector<8x256xf32>
    %191 = vector.shape_cast %188 : vector<8x256xf32> to vector<1x8x256xf32>
    tpu.vector_store %arg15[%c0_60, %c0_61, %c0_62], %191 {strides = array<i32>} : memref<1x8x256xf32, #tpu.memory_space<vmem>>, vector<1x8x256xf32>,
    return
  }
  func.func @transform_0(%arg0: i32) -> (i32, i32) {
    %c0_i32 = arith.constant 0 : i32
    %c0_i32_0 = arith.constant 0 : i32
    %c0_i32_1 = arith.constant 0 : i32
    return %c0_i32, %c0_i32_0 : i32, i32
  }
  func.func @transform_1(%arg0: i32) -> (i32, i32) {
    %c0_i32 = arith.constant 0 : i32
    %c0_i32_0 = arith.constant 0 : i32
    %c0_i32_1 = arith.constant 0 : i32
    return %c0_i32, %c0_i32_0 : i32, i32
  }
  func.func @transform_2(%arg0: i32) -> (i32, i32, i32) {
    %c0_i32 = arith.constant 0 : i32
    %c0_i32_0 = arith.constant 0 : i32
    %c0_i32_1 = arith.constant 0 : i32
    return %arg0, %c0_i32, %c0_i32_0 : i32, i32, i32
  }
  func.func @transform_3(%arg0: i32) -> (i32, i32, i32) {
    %c0_i32 = arith.constant 0 : i32
    %c0_i32_0 = arith.constant 0 : i32
    %c0_i32_1 = arith.constant 0 : i32
    return %arg0, %c0_i32, %c0_i32_0 : i32, i32, i32
  }
  func.func @transform_4(%arg0: i32) -> (i32, i32) {
    %c0_i32 = arith.constant 0 : i32
    %c0_i32_0 = arith.constant 0 : i32
    %c0_i32_1 = arith.constant 0 : i32
    return %c0_i32, %c0_i32_0 : i32, i32
  }
  func.func @transform_5(%arg0: i32) -> (i32, i32) {
    %c0_i32 = arith.constant 0 : i32
    %c0_i32_0 = arith.constant 0 : i32
    %c0_i32_1 = arith.constant 0 : i32
    return %c0_i32, %c0_i32_0 : i32, i32
  }
  func.func @transform_6(%arg0: i32) -> (i32, i32) {
    %c0_i32 = arith.constant 0 : i32
    %c0_i32_0 = arith.constant 0 : i32
    %c0_i32_1 = arith.constant 0 : i32
    return %c0_i32, %c0_i32_0 : i32, i32
  }
  func.func @transform_7(%arg0: i32) -> (i32, i32) {
    %c0_i32 = arith.constant 0 : i32
    %c0_i32_0 = arith.constant 0 : i32
    %c0_i32_1 = arith.constant 0 : i32
    return %c0_i32, %c0_i32_0 : i32, i32
  }
  func.func @transform_8(%arg0: i32) -> (i32, i32) {
    %c0_i32 = arith.constant 0 : i32
    %c0_i32_0 = arith.constant 0 : i32
    %c0_i32_1 = arith.constant 0 : i32
    return %c0_i32, %c0_i32_0 : i32, i32
  }
  func.func @transform_9(%arg0: i32) -> (i32, i32) {
    %c0_i32 = arith.constant 0 : i32
    %c0_i32_0 = arith.constant 0 : i32
    %c0_i32_1 = arith.constant 0 : i32
    return %c0_i32, %c0_i32_0 : i32, i32
  }
  func.func @transform_10(%arg0: i32) -> (i32, i32) {
    %c0_i32 = arith.constant 0 : i32
    %c0_i32_0 = arith.constant 0 : i32
    %c0_i32_1 = arith.constant 0 : i32
    return %c0_i32, %c0_i32_0 : i32, i32
  }
  func.func @transform_11(%arg0: i32) -> (i32, i32) {
    %c0_i32 = arith.constant 0 : i32
    %c0_i32_0 = arith.constant 0 : i32
    %c0_i32_1 = arith.constant 0 : i32
    return %c0_i32, %c0_i32_0 : i32, i32
  }
  func.func @transform_12(%arg0: i32) -> (i32, i32) {
    %c0_i32 = arith.constant 0 : i32
    %c0_i32_0 = arith.constant 0 : i32
    %c0_i32_1 = arith.constant 0 : i32
    return %c0_i32, %c0_i32_0 : i32, i32
  }
  func.func @transform_13(%arg0: i32) -> (i32, i32) {
    %c0_i32 = arith.constant 0 : i32
    %c0_i32_0 = arith.constant 0 : i32
    %c0_i32_1 = arith.constant 0 : i32
    return %c0_i32, %c0_i32_0 : i32, i32
  }
  func.func @transform_14(%arg0: i32) -> (i32, i32, i32) {
    %c0_i32 = arith.constant 0 : i32
    %c0_i32_0 = arith.constant 0 : i32
    %c0_i32_1 = arith.constant 0 : i32
    return %arg0, %c0_i32, %c0_i32_0 : i32, i32, i32
  }
}

</mosaic_0001>

<bundles_post_ra>
// kernel: unet_basic_up_block.1
= control target key start
LH: loop header
LB: loop body
LE: loop exit
PB: predicated region body
PF: predicated region fallthrough
CT: control target
= control target key end

     0   :  { %s1502_s29 = smov 0   ;;  %s1996_s0 = inlined_call_operand.vmem [shape: f32[9,256], index: 0, kind: input, shape index: {}]   ;;  %s1997_s1 = inlined_call_operand.vmem [shape: bf16[64,256], index: 1, kind: input, shape index: {}]   ;;  %s1998_s2 = inlined_call_operand.vmem [shape: bf16[2,8,64], index: 2, kind: input, shape index: {}]   ;;  %s1999_s3 = inlined_call_operand.vmem [shape: bf16[2,8,256], index: 3, kind: input, shape index: {}]   ;;  %s2000_s4 = inlined_call_operand.vmem [shape: bf16[8,72], index: 4, kind: input, shape index: {}]   ;;  %s2001_s5 = inlined_call_operand.vmem [shape: f32[8,1], index: 5, kind: input, shape index: {}]   ;;  %s2002_s6 = inlined_call_operand.vmem [shape: f32[8,1], index: 6, kind: input, shape index: {}]   ;;  %s2003_s7 = inlined_call_operand.vmem [shape: bf16[8,72], index: 7, kind: input, shape index: {}]   ;;  %s2004_s8 = inlined_call_operand.vmem [shape: bf16[8,72], index: 8, kind: input, shape index: {}]   ;;  %s2005_s9 = inlined_call_operand.vmem [shape: f32[8,1], index: 9, kind: input, shape index: {}]   ;;  %s2006_s10 = inlined_call_operand.vmem [shape: f32[8,1], index: 10, kind: input, shape index: {}]   ;;  %s2007_s11 = inlined_call_operand.vmem [shape: bf16[8,72], index: 11, kind: input, shape index: {}]   ;;  %s2008_s12 = inlined_call_operand.vmem [shape: f32[8,1], index: 12, kind: input, shape index: {}]   ;;  %s2009_s13 = inlined_call_operand.vmem [shape: f32[8,1], index: 13, kind: input, shape index: {}]   ;;  %s2010_s14 = inlined_call_operand.vmem [shape: f32[2,8,256], index: 14, kind: output, shape index: {}]  }
   0x1 LB: > { %s1302_s30 = sadd.s32 4294967295, %s1416_s29   ;;  %p1306_p0 = scmp.ge.s32.totalorder %s1416_s29, 1  ;;  %s1416_s29 = sphi %s1502_s29, %s24_s29  }
   0x2   : > { %p421_p1 = scmp.lt.s32.totalorder %s1416_s29, 3 }
   0x4   : > { %p422_p2 = pnand %p1306_p0, %p421_p1 }
   0x5   : > { %v1398_v0 = vld [vmem:[%s1997_s1 + $0x4] ss:$8 sps:$4 sm:$0xff] (!%p422_p2)   ;;  %v1400_v1 = vld [vmem:[%s1997_s1] ss:$8 sps:$4 sm:$0xff] (!%p422_p2)   ;;  %v1418_v2 = vmov (!%p422_p2), 0   ;;  %p471_p3 = scmp.lt.s32.totalorder (!%p422_p2), %s1302_s30, 1  ;;  %v589_v20 = vlaneseq (!%p422_p2) }
   0x6   : > { %425 = sbr.rel (%p422_p2) target bundleno = 1349 (0x545), region = 76  ;;  %575 = vmatprep.mubr.bf16.mxu0 (!%p422_p2), %v1418_v2  ;;  %786 = vmatprep.mubr.bf16.mxu1 (!%p422_p2), %v1418_v2  ;;  %v1401_v3 = vld [vmem:[%s1997_s1 + $0x14] ss:$8 sps:$4 sm:$0xff] (!%p422_p2)   ;;  %v1403_v4 = vld [vmem:[%s1997_s1 + $0x10] ss:$8 sps:$4 sm:$0xff] (!%p422_p2)   ;;  %vm539_vm0 = vcmask (!%p422_p2), 523264  }
   0x7   : > { %543 = vmatprep.subr.bf16.mxu0 (!%p422_p2), %v1398_v0  ;;  %1356 = vset.pattern.permute.xlu0 (!%p422_p2), %v1418_v2  ;;  %v1404_v5 = vld [vmem:[%s1997_s1 + $0x24] ss:$8 sps:$4 sm:$0xff] (!%p422_p2)   ;;  %v1406_v6 = vld [vmem:[%s1997_s1 + $0x20] ss:$8 sps:$4 sm:$0xff] (!%p422_p2)   ;;  %v1407_v7 = vld [vmem:[%s1997_s1 + $0x34] ss:$8 sps:$4 sm:$0xff] (!%p422_p2)  }
   0x8   : > { %544 = vmatpush1.bf16.msra.mxu0 (!%p422_p2), %v1400_v1  ;;  %1357 = vset.pattern.permute.xlu1 (!%p422_p2), %v1418_v2  ;;  %v1409_v8 = vld [vmem:[%s1997_s1 + $0x30] ss:$8 sps:$4 sm:$0xff] (!%p422_p2)   ;;  %s1419_s21 = smov (!%p422_p2), 16   ;;  %s1420_s22 = smov (!%p422_p2), 17   ;;  %v795_v17 = vld [vmem:[%s2001_s5] sm:$0xff] (!%p422_p2)  ;;  %v1615_v23 = vand.u32 (!%p422_p2), 127, %v589_v20 }
   0x9   : > { %545 = vmatprep.subr.bf16.mxu0 (!%p422_p2), %v1401_v3  ;;  %s1421_s23 = smov (!%p422_p2), 15   ;;  %s1422_s24 = smov (!%p422_p2), 1   ;;  %v803_v18 = vld [vmem:[%s2002_s6] sm:$0xff] (!%p422_p2)  ;;  %v1617_v24 = vshrl.u32 (!%p422_p2), %v589_v20, 7  ;;  %v1631_v31 = vld [vmem:[%s1996_s0 + $0x8] sm:$0xff] (!%p422_p2)  ;;  %vm747_vm9 = vcmask (!%p422_p2), 1043456  }
   0xa   : > { %s1423_s25 = smov (!%p422_p2), 127   ;;  %s1424_s27 = smov (!%p422_p2), 113   ;;  %vm608_vm1 = vcmp.lt.s32.totalorder (!%p422_p2), %v1615_v23, 16  ;;  %v1626_v30 = vld [vmem:[%s1996_s0] sm:$0xff] (!%p422_p2)  ;;  %vm625_vm2 = vcmp.lt.s32.totalorder (!%p422_p2), %v1615_v23, 15  ;;  %vm642_vm3 = vcmp.lt.s32.totalorder (!%p422_p2), %v1615_v23, 1 }
   0xb   : > { %s1425_s17 = smov (!%p422_p2), 112   ;;  %s1426_s18 = smov (!%p422_p2), 111   ;;  %v613_v26 = vsub.s32 (!%p422_p2), 1, %v1617_v24  ;;  %v647_v28 = vsub.s32 (!%p422_p2), 3, %v1617_v24  ;;  %v596_v29 = vsub.s32 (!%p422_p2), 0, %v1617_v24  ;;  %v630_v32 = vsub.s32 (!%p422_p2), 2, %v1617_v24 }
   0xc   : > { %546 = vmatpush1.bf16.msra.mxu0 (!%p422_p2), %v1403_v4  ;;  %v674_v36 = vsub.s32 (!%p422_p2), 5, %v1617_v24  ;;  %vm591_vm4 = vcmp.lt.s32.totalorder (!%p422_p2), %v1615_v23, 17  ;;  %v657_v45 = vsub.s32 (!%p422_p2), 4, %v1617_v24  ;;  %vm669_vm5 = vcmp.lt.s32.totalorder (!%p422_p2), %v1615_v23, 127 }
   0xd   : > { %s2012_s30 = smov (!%p471_p3, %s1302_s30), 1  ;;  %547 = vmatprep.subr.bf16.mxu0 %v1404_v5  ;;  %v1635_v33 = vrot.slane %v1626_v30, %v613_v26  ;;  %v1639_v37 = vrot.slane %v1631_v31, %v613_v26  ;;  %v1648_v40 = vrot.slane %v1631_v31, %v647_v28  ;;  %v1652_v41 = vrot.slane %v1626_v30, %v596_v29 }
   0xe   : > { %s1307_s15 = sshll.u32 %s2012_s30, 2  ;;  %s1333_s26 = sshll.u32 %s2012_s30, 3  ;;  %v1655_v42 = vrot.slane %v1631_v31, %v596_v29  ;;  %v1658_v43 = vrot.slane %v1631_v31, %v630_v32  ;;  %v1661_v44 = vrot.slane %v1626_v30, %v647_v28  ;;  %v1667_v49 = vrot.slane %v1631_v31, %v674_v36 }
   0xf   : > { %s474_s20 = scalar_lea.vmem %s1998_s2, %s1307_s15  ;;  %s479_s16 = scalar_lea.vmem %s1999_s3, %s1333_s26  ;;  %v1684_v59 = vrot.slane %v1626_v30, %v630_v32  ;;  %v1687_v60 = vrot.slane %v1631_v31, %v657_v45  ;;  %v1694_v5 = vrot.slane %v1626_v30, %v674_v36  ;;  %vm686_vm6 = vcmp.lt.s32.totalorder %v1615_v23, 113 }
  0x10   : > { %548 = vmatpush1.bf16.msra.mxu0 %v1406_v6  ;;  %v490_v9 = vld [vmem:[%s474_s20] sm:$0xf]  ;;  %vm703_vm7 = vcmp.lt.s32.totalorder %v1615_v23, 112  ;;  %vm720_vm8 = vcmp.lt.s32.totalorder %v1615_v23, 111  ;;  %vm743_vm10 = vcmask 588800  }
  0x11   : > { %549 = vmatprep.subr.bf16.mxu0 %v1407_v7  ;;  %v1581_v14 = vld [vmem:[%s479_s16] sm:$0xff]  ;;  %v691_v7 = vsub.s32 6, %v1617_v24 }
  0x12   : > { %v814_v15 = vunpack.c.l.bf16 %v1581_v14  ;;  %v815_v16 = vunpack.c.h.bf16 %v1581_v14 }
  0x13   : > { %v1712_v26 = vrot.slane %v1626_v30, %v691_v7 }
  0x14   : > { %550 = vmatpush1.bf16.msra.mxu0 %v1409_v8  ;;  %v1599_v19 = vpack.i.bf16 %v815_v16, %v814_v15 }
  0x17   : > { %1320 = vmatmul.mubr.msk.bf16.vlgmr.msra.gmra.mrb[0].mxu0 %vm539_vm0, %v490_v9 }
  0x18   : > { %1011 = vmatprep.mubr.bf16.mxu0 %v1418_v2 }
  0xea   : > { %v1545_v10 = vpop.f32.mrb[0].mxu0 }
  0xeb   : > { %604 = vrot.lane.b32.xlu1 %v1545_v10, %s1419_s21  ;;  %585 = vrot.lane.b32.xlu0 %v1545_v10, %s1420_s22  ;;  %v1551_v11 = vpop.f32.mrb[1].mxu0 }
  0xec   : > { %v581_v12 = vpop.f32.mrb[2].mxu0 }
  0xed   : > { %v582_v13 = vpop.f32.mrb[3].mxu0 }
  0xee   : > { %v708_v13 = vsub.s32 7, %v1617_v24  ;;  %v1715_v24 = vrot.slane %v1631_v31, %v691_v7 }
  0xef   : > { %621 = vrot.lane.b32.xlu0 %v1545_v10, %s1421_s23  ;;  %606 = vrot.lane.b32.xlu1 %v1551_v11, %s1419_s21 }
  0xf0   : > { %v1719_v28 = vrot.slane %v1626_v30, %v708_v13  ;;  %v1722_v29 = vrot.slane %v1631_v31, %v708_v13 }
  0xf3   : > { %638 = vrot.lane.b32.xlu0 %v1545_v10, %s1422_s24  ;;  %623 = vrot.lane.b32.xlu1 %v1551_v11, %s1421_s23 }
  0xf7   : > { %640 = vrot.lane.b32.xlu1 %v1551_v11, %s1422_s24  ;;  %587 = vrot.lane.b32.xlu0 %v1551_v11, %s1420_s22 }
  0xfb   : > { %667 = vrot.lane.b32.xlu1 %v1551_v11, %s1423_s25  ;;  %665 = vrot.lane.b32.xlu0 %v1545_v10, %s1423_s25 }
  0xff   : > { %684 = vrot.lane.b32.xlu1 %v1551_v11, %s1424_s27  ;;  %682 = vrot.lane.b32.xlu0 %v1545_v10, %s1424_s27 }
 0x103   : > { %701 = vrot.lane.b32.xlu1 %v1551_v11, %s1425_s17  ;;  %699 = vrot.lane.b32.xlu0 %v1545_v10, %s1425_s17 }
 0x107   : > { %718 = vrot.lane.b32.xlu1 %v1551_v11, %s1426_s18  ;;  %716 = vrot.lane.b32.xlu0 %v1545_v10, %s1426_s18 }
 0x10b   : > { %798 = vperm.xlu0 %1356, %v795_v17   ;;  %806 = vperm.xlu1 %1357, %v803_v18   ;;  %v1705_v18 = vrot.slane %v1626_v30, %v657_v45 }
 0x10f   : > { %1359 = vrot.lane.b32.xlu1 %v1599_v19, %s1420_s22  ;;  %1364 = vrot.lane.b32.xlu0 %v1599_v19, %s1419_s21 }
 0x113   : > { %1369 = vrot.lane.b32.xlu1 %v1599_v19, %s1421_s23  ;;  %1374 = vrot.lane.b32.xlu0 %v1599_v19, %s1422_s24 }
 0x117   : > { %1379 = vrot.lane.b32.xlu1 %v1599_v19, %s1423_s25  ;;  %1384 = vrot.lane.b32.xlu0 %v1599_v19, %s1424_s27 }
 0x11b   : > { %1389 = vrot.lane.b32.xlu1 %v1599_v19, %s1425_s17  ;;  %1394 = vrot.lane.b32.xlu0 %v1599_v19, %s1426_s18 }
 0x15d   : > { %v605_v21 = vpop.permute.xlu1 %604  ;;  %v586_v22 = vpop.permute.xlu0 %585 }
 0x161   : > { %v622_v25 = vpop.permute.xlu0 %621  ;;  %v607_v27 = vpop.permute.xlu1 %606 }
 0x162   : > { %v609_v38 = vsel %vm608_vm1, %v605_v21, %v607_v27  ;;  %v610_v39 = vsel %vm608_vm1, %v607_v27, %v605_v21 }
 0x163   : > { %v619_v46 = vmul.f32 %v1635_v33, %v610_v39  ;;  %v620_v50 = vmul.f32 %v1639_v37, %v609_v38 }
 0x165   : > { %v639_v34 = vpop.permute.xlu0 %638  ;;  %v624_v35 = vpop.permute.xlu1 %623 }
 0x166   : > { %v626_v51 = vsel %vm625_vm2, %v622_v25, %v624_v35  ;;  %v627_v61 = vsel %vm625_vm2, %v624_v35, %v622_v25  ;;  %v663_v35 = vmul.f32 %v1705_v18, %v1545_v10 }
 0x167   : > { %v637_v62 = vmul.f32 %v1658_v43, %v626_v51  ;;  %v636_v17 = vmul.f32 %v1684_v59, %v627_v61 }
 0x169   : > { %v641_v47 = vpop.permute.xlu1 %640  ;;  %v588_v48 = vpop.permute.xlu0 %587 }
 0x16a   : > { %v643_v52 = vsel %vm642_vm3, %v639_v34, %v641_v47  ;;  %v592_v53 = vsel %vm591_vm4, %v586_v22, %v588_v48  ;;  %v593_v54 = vsel %vm591_vm4, %v588_v48, %v586_v22  ;;  %v644_v55 = vsel %vm642_vm3, %v641_v47, %v639_v34  ;;  %v1742_v48 = vld [vmem:[%s1996_s0 + $0x10] ss:$0 sm:$0xff] }
 0x16b   : > { %v654_v56 = vmul.f32 %v1648_v40, %v643_v52  ;;  %v602_v57 = vmul.f32 %v1652_v41, %v593_v54  ;;  %v603_v58 = vmul.f32 %v1655_v42, %v592_v53  ;;  %v653_v4 = vmul.f32 %v1661_v44, %v644_v55 }
 0x16c   : > { %v664_v22 = vmul.f32 %v1687_v60, %v1551_v11 }
 0x16d   : > { %v668_v63 = vpop.permute.xlu1 %667  ;;  %v666_v0 = vpop.permute.xlu0 %665  ;;  %v734_v1 = vpack.c.bf16 %v620_v50, %v603_v58  ;;  %v733_v3 = vpack.c.bf16 %v619_v46, %v602_v57  ;;  %v736_v12 = vpack.c.bf16 %v654_v56, %v637_v62  ;;  %v735_v27 = vpack.c.bf16 %v653_v4, %v636_v17  ;;  %v1747_v50 = vld [vmem:[%s1996_s0 + $0x18] ss:$0 sm:$0xff] }
 0x16e   : > { %v671_v6 = vsel %vm669_vm5, %v668_v63, %v666_v0  ;;  %v670_v8 = vsel %vm669_vm5, %v666_v0, %v668_v63  ;;  %v584_v0 = vld [vmem:[%s2000_s4] sm:$0xf] }
 0x16f   : > { %v681_v9 = vmul.f32 %v1667_v49, %v671_v6  ;;  %754 = vmatprep.subr.bf16.mxu1 %v734_v1  ;;  %v680_v25 = vmul.f32 %v1694_v5, %v670_v8 }
 0x170   : > { %755 = vmatpush1.bf16.msra.mxu1 %v733_v3 }
 0x171   : > { %v685_v20 = vpop.permute.xlu1 %684  ;;  %756 = vmatprep.subr.bf16.mxu1 %v736_v12  ;;  %v683_v21 = vpop.permute.xlu0 %682  ;;  %v738_v32 = vpack.c.bf16 %v681_v9, %v664_v22  ;;  %v737_v39 = vpack.c.bf16 %v680_v25, %v663_v35 }
 0x172   : > { %v687_v11 = vsel %vm686_vm6, %v683_v21, %v685_v20  ;;  %v688_v34 = vsel %vm686_vm6, %v685_v20, %v683_v21 }
 0x173   : > { %v697_v45 = vmul.f32 %v1712_v26, %v687_v11  ;;  %v698_v46 = vmul.f32 %v1715_v24, %v688_v34 }
 0x174   : > { %757 = vmatpush1.bf16.msra.mxu1 %v735_v27 }
 0x175   : > { %v702_v36 = vpop.permute.xlu1 %701  ;;  %v700_v38 = vpop.permute.xlu0 %699  ;;  %758 = vmatprep.subr.bf16.mxu1 %v738_v32 }
 0x176   : > { %v704_v30 = vsel %vm703_vm7, %v700_v38, %v702_v36  ;;  %v705_v31 = vsel %vm703_vm7, %v702_v36, %v700_v38 }
 0x177   : > { %v714_v47 = vmul.f32 %v1719_v28, %v704_v30  ;;  %v715_v10 = vmul.f32 %v1722_v29, %v705_v31 }
 0x178   : > { %759 = vmatpush1.bf16.msra.mxu1 %v737_v39 }
 0x179   : > { %v719_v51 = vpop.permute.xlu1 %718  ;;  %v717_v52 = vpop.permute.xlu0 %716  ;;  %v740_v53 = vpack.c.bf16 %v715_v10, %v698_v46  ;;  %v739_v54 = vpack.c.bf16 %v714_v47, %v697_v45 }
 0x17a   : > { %v721_v55 = vsel %vm720_vm8, %v717_v52, %v719_v51  ;;  %v722_v56 = vsel %vm720_vm8, %v719_v51, %v717_v52 }
 0x17b   : > { %v731_v57 = vmul.f32 %v1742_v48, %v721_v55  ;;  %v732_v58 = vmul.f32 %v1747_v50, %v722_v56  ;;  %760 = vmatprep.subr.bf16.mxu1 %v740_v53 }
 0x17c   : > { %761 = vmatpush1.bf16.msra.mxu1 %v739_v54 }
 0x17d   : > { %v741_v61 = vpack.c.bf16 %v731_v57, %v731_v57  ;;  %v742_v62 = vpack.c.bf16 %v732_v58, %v732_v58 }
 0x17f   : > { %1323 = vmatprep.subr.msk.bf16.mxu1 %vm747_vm9, %v742_v62  ;;  %v749_v63 = vsel %vm747_vm9, %v741_v61, 0 }
 0x180   : > { %763 = vmatpush1.bf16.msra.mxu1 %v749_v63 }
 0x183   : > { %1324 = vmatmul.mubr.msk.bf16.vlgmr.msra.gmra.mrb[0].mxu1 %vm743_vm10, %v584_v0  ;;  %v927_v0 = vmul.f32 %v815_v16, %v1687_v60 }
 0x184   : > { %1206 = vmatprep.mubr.bf16.mxu1 %v1418_v2 }
 0x18a   : > { %v1764_v1 = vpop.permute.xlu0 %798  ;;  %v1766_v3 = vpop.permute.xlu1 %806 }
 0x18e   : > { %v1360_v4 = vpop.permute.xlu1 %1359  ;;  %v1365_v6 = vpop.permute.xlu0 %1364 }
 0x18f   : > { %v1362_v7 = vunpack.i.h.bf16 %v1360_v4  ;;  %v1361_v8 = vunpack.i.l.bf16 %v1360_v4  ;;  %v1367_v9 = vunpack.i.h.bf16 %v1365_v6  ;;  %v1366_v12 = vunpack.i.l.bf16 %v1365_v6 }
 0x190   : > { %v926_v4 = vmul.f32 %v814_v15, %v1705_v18 }
 0x191   : > { %v898_v13 = vsel %vm591_vm4, %v1361_v8, %v1362_v7  ;;  %v899_v17 = vsel %vm591_vm4, %v1362_v7, %v1361_v8  ;;  %v906_v20 = vsel %vm608_vm1, %v1366_v12, %v1367_v9  ;;  %v907_v19 = vsel %vm608_vm1, %v1367_v9, %v1366_v12 }
 0x192   : > { %v900_v21 = vmul.f32 %v899_v17, %v1652_v41  ;;  %v908_v22 = vmul.f32 %v907_v19, %v1635_v33  ;;  %v1370_v25 = vpop.permute.xlu1 %1369  ;;  %v1375_v27 = vpop.permute.xlu0 %1374  ;;  %v901_v32 = vmul.f32 %v898_v13, %v1655_v42  ;;  %v909_v11 = vmul.f32 %v906_v20, %v1639_v37 }
 0x193   : > { %v1372_v34 = vunpack.i.h.bf16 %v1370_v25  ;;  %v1371_v35 = vunpack.i.l.bf16 %v1370_v25  ;;  %v1377_v36 = vunpack.i.h.bf16 %v1375_v27  ;;  %v1376_v38 = vunpack.i.l.bf16 %v1375_v27 }
 0x194   : > { %v961_v30 = vpack.c.bf16 %v909_v11, %v901_v32  ;;  %v960_v31 = vpack.c.bf16 %v908_v22, %v900_v21 }
 0x195   : > { %v914_v39 = vsel %vm625_vm2, %v1371_v35, %v1372_v34  ;;  %v915_v45 = vsel %vm625_vm2, %v1372_v34, %v1371_v35  ;;  %v922_v46 = vsel %vm642_vm3, %v1376_v38, %v1377_v36  ;;  %v923_v47 = vsel %vm642_vm3, %v1377_v36, %v1376_v38 }
 0x196   : > { %v916_v10 = vmul.f32 %v915_v45, %v1684_v59  ;;  %v924_v51 = vmul.f32 %v923_v47, %v1661_v44  ;;  %v1380_v52 = vpop.permute.xlu1 %1379  ;;  %979 = vmatprep.subr.bf16.mxu0 %v961_v30  ;;  %v1385_v53 = vpop.permute.xlu0 %1384  ;;  %v917_v54 = vmul.f32 %v914_v39, %v1658_v43  ;;  %v925_v55 = vmul.f32 %v922_v46, %v1648_v40 }
 0x197   : > { %v1382_v56 = vunpack.i.h.bf16 %v1380_v52  ;;  %v1381_v57 = vunpack.i.l.bf16 %v1380_v52  ;;  %980 = vmatpush1.bf16.msra.mxu0 %v960_v31  ;;  %v1387_v58 = vunpack.i.h.bf16 %v1385_v53  ;;  %v1386_v61 = vunpack.i.l.bf16 %v1385_v53 }
 0x198   : > { %v963_v62 = vpack.c.bf16 %v925_v55, %v917_v54  ;;  %v962_v63 = vpack.c.bf16 %v924_v51, %v916_v10 }
 0x199   : > { %v932_v6 = vsel %vm669_vm5, %v1381_v57, %v1382_v56  ;;  %v933_v7 = vsel %vm669_vm5, %v1382_v56, %v1381_v57  ;;  %v941_v8 = vsel %vm686_vm6, %v1387_v58, %v1386_v61  ;;  %v940_v27 = vsel %vm686_vm6, %v1386_v61, %v1387_v58  ;;  %v893_v61 = vld [vmem:[%s2004_s8] sm:$0xf] }
 0x19a   : > { %v934_v9 = vmul.f32 %v932_v6, %v1694_v5  ;;  %v1390_v12 = vpop.permute.xlu1 %1389  ;;  %981 = vmatprep.subr.bf16.mxu0 %v963_v62  ;;  %v935_v13 = vmul.f32 %v933_v7, %v1667_v49  ;;  %v943_v20 = vmul.f32 %v941_v8, %v1715_v24  ;;  %v942_v11 = vmul.f32 %v940_v27, %v1712_v26  ;;  %v1395_v34 = vpop.permute.xlu0 %1394 }
 0x19b   : > { %v1392_v16 = vunpack.i.h.bf16 %v1390_v12  ;;  %v1391_v17 = vunpack.i.l.bf16 %v1390_v12  ;;  %982 = vmatpush1.bf16.msra.mxu0 %v962_v63  ;;  %v1397_v35 = vunpack.i.h.bf16 %v1395_v34  ;;  %v1396_v36 = vunpack.i.l.bf16 %v1395_v34 }
 0x19c   : > { %v965_v14 = vpack.c.bf16 %v935_v13, %v927_v0  ;;  %v964_v15 = vpack.c.bf16 %v934_v9, %v926_v4 }
 0x19d   : > { %v949_v19 = vsel %vm703_vm7, %v1392_v16, %v1391_v17  ;;  %v948_v25 = vsel %vm703_vm7, %v1391_v17, %v1392_v16  ;;  %v956_v30 = vsel %vm720_vm8, %v1396_v36, %v1397_v35  ;;  %v957_v31 = vsel %vm720_vm8, %v1397_v35, %v1396_v36 }
 0x19e   : > { %983 = vmatprep.subr.bf16.mxu0 %v965_v14  ;;  %v951_v21 = vmul.f32 %v949_v19, %v1722_v29  ;;  %v950_v32 = vmul.f32 %v948_v25, %v1719_v28  ;;  %v959_v39 = vmul.f32 %v1747_v50, %v957_v31  ;;  %v958_v45 = vmul.f32 %v1742_v48, %v956_v30 }
 0x19f   : > { %984 = vmatpush1.bf16.msra.mxu0 %v964_v15 }
 0x1a0   : > { %v967_v22 = vpack.c.bf16 %v951_v21, %v943_v20  ;;  %v966_v38 = vpack.c.bf16 %v950_v32, %v942_v11  ;;  %v969_v46 = vpack.c.bf16 %v959_v39, %v959_v39  ;;  %v968_v47 = vpack.c.bf16 %v958_v45, %v958_v45 }
 0x1a2   : > { %985 = vmatprep.subr.bf16.mxu0 %v967_v22  ;;  %v974_v10 = vsel %vm747_vm9, %v968_v47, 0 }
 0x1a3   : > { %986 = vmatpush1.bf16.msra.mxu0 %v966_v38 }
 0x1a4   : > { %1325 = vmatprep.subr.msk.bf16.mxu0 %vm747_vm9, %v969_v46 }
 0x1a7   : > { %988 = vmatpush1.bf16.msra.mxu0 %v974_v10 }
 0x1aa   : > { %1326 = vmatmul.mubr.msk.bf16.vlgmr.msra.gmra.mrb[4].mxu0 %vm743_vm10, %v893_v61 }
 0x1ab   : > { %1061 = vmatprep.mubr.bf16.mxu0 %v1418_v2  ;;  %v1070_v2 = vld [vmem:[%s2005_s9] sm:$0xff] }
 0x256   : > { %v788_v51 = vpop.f32.mrb[0].mxu1 }
 0x257   : > { %v801_v52 = vmul.f32 %v1764_v1, %v788_v51  ;;  %v790_v53 = vpop.f32.mrb[1].mxu1 }
 0x258   : > { %v802_v54 = vmul.f32 %v1764_v1, %v790_v53  ;;  %v792_v55 = vpop.f32.mrb[2].mxu1  ;;  %v1078_v1 = vld [vmem:[%s2006_s10] sm:$0xff] }
 0x259   : > { %v809_v56 = vadd.f32 %v1766_v3, %v801_v52  ;;  %v793_v57 = vpop.f32.mrb[3].mxu1 }
 0x25a   : > { %v810_v58 = vadd.f32 %v1766_v3, %v802_v54 }
 0x25b   : > { %v811_v62 = vmax.f32 %v809_v56, 0.0 }
 0x25c   : > { %v812_v63 = vmax.f32 %v810_v58, 0.0 }
 0x25d   : > { %817 = vrot.lane.b32.xlu1 %v811_v62, %s1420_s22  ;;  %v849_v51 = vmul.f32 %v811_v62, %v1705_v18 }
 0x25e   : > { %819 = vrot.lane.b32.xlu0 %v812_v63, %s1420_s22  ;;  %v850_v54 = vmul.f32 %v812_v63, %v1687_v60 }
 0x261   : > { %825 = vrot.lane.b32.xlu1 %v811_v62, %s1419_s21 }
 0x262   : > { %827 = vrot.lane.b32.xlu0 %v812_v63, %s1419_s21 }
 0x265   : > { %833 = vrot.lane.b32.xlu1 %v811_v62, %s1421_s23 }
 0x266   : > { %835 = vrot.lane.b32.xlu0 %v812_v63, %s1421_s23 }
 0x269   : > { %841 = vrot.lane.b32.xlu1 %v811_v62, %s1422_s24 }
 0x26a   : > { %843 = vrot.lane.b32.xlu0 %v812_v63, %s1422_s24 }
 0x26d   : > { %851 = vrot.lane.b32.xlu1 %v811_v62, %s1423_s25 }
 0x26e   : > { %853 = vrot.lane.b32.xlu0 %v812_v63, %s1423_s25 }
 0x271   : > { %859 = vrot.lane.b32.xlu1 %v811_v62, %s1424_s27 }
 0x272   : > { %861 = vrot.lane.b32.xlu0 %v812_v63, %s1424_s27 }
 0x275   : > { %867 = vrot.lane.b32.xlu1 %v811_v62, %s1425_s17 }
 0x276   : > { %869 = vrot.lane.b32.xlu0 %v812_v63, %s1425_s17 }
 0x279   : > { %875 = vrot.lane.b32.xlu1 %v811_v62, %s1426_s18 }
 0x27a   : > { %877 = vrot.lane.b32.xlu0 %v812_v63, %s1426_s18 }
 0x27d   : > { %1073 = vperm.xlu1 %1357, %v1070_v2  }
 0x27e   : > { %1081 = vperm.xlu0 %1356, %v1078_v1  }
 0x2cf   : > { %v818_v3 = vpop.permute.xlu1 %817 }
 0x2d0   : > { %v820_v0 = vpop.permute.xlu0 %819 }
 0x2d1   : > { %v821_v4 = vsel %vm591_vm4, %v818_v3, %v820_v0  ;;  %v822_v6 = vsel %vm591_vm4, %v820_v0, %v818_v3 }
 0x2d2   : > { %v823_v13 = vmul.f32 %v822_v6, %v1652_v41  ;;  %v824_v16 = vmul.f32 %v821_v4, %v1655_v42 }
 0x2d3   : > { %v826_v7 = vpop.permute.xlu1 %825 }
 0x2d4   : > { %v828_v8 = vpop.permute.xlu0 %827 }
 0x2d5   : > { %v829_v9 = vsel %vm608_vm1, %v826_v7, %v828_v8  ;;  %v830_v12 = vsel %vm608_vm1, %v828_v8, %v826_v7 }
 0x2d6   : > { %v831_v17 = vmul.f32 %v830_v12, %v1635_v33  ;;  %v832_v14 = vmul.f32 %v829_v9, %v1639_v37 }
 0x2d7   : > { %v834_v15 = vpop.permute.xlu1 %833 }
 0x2d8   : > { %v883_v20 = vpack.c.bf16 %v831_v17, %v823_v13  ;;  %v836_v19 = vpop.permute.xlu0 %835  ;;  %v884_v21 = vpack.c.bf16 %v832_v14, %v824_v16 }
 0x2d9   : > { %v837_v22 = vsel %vm625_vm2, %v834_v15, %v836_v19  ;;  %v838_v25 = vsel %vm625_vm2, %v836_v19, %v834_v15 }
 0x2da   : > { %1029 = vmatprep.subr.bf16.mxu0 %v884_v21  ;;  %v839_v35 = vmul.f32 %v838_v25, %v1684_v59  ;;  %v840_v36 = vmul.f32 %v837_v22, %v1658_v43  ;;  %v816_v22 = vld [vmem:[%s2003_s7] sm:$0xf] }
 0x2db   : > { %v842_v27 = vpop.permute.xlu1 %841  ;;  %1030 = vmatpush1.bf16.msra.mxu0 %v883_v20 }
 0x2dc   : > { %v844_v32 = vpop.permute.xlu0 %843 }
 0x2dd   : > { %v845_v11 = vsel %vm642_vm3, %v842_v27, %v844_v32  ;;  %v846_v34 = vsel %vm642_vm3, %v844_v32, %v842_v27 }
 0x2de   : > { %v847_v38 = vmul.f32 %v846_v34, %v1661_v44  ;;  %v848_v30 = vmul.f32 %v845_v11, %v1648_v40 }
 0x2df   : > { %v852_v31 = vpop.permute.xlu1 %851 }
 0x2e0   : > { %v885_v39 = vpack.c.bf16 %v847_v38, %v839_v35  ;;  %v854_v45 = vpop.permute.xlu0 %853  ;;  %v886_v46 = vpack.c.bf16 %v848_v30, %v840_v36 }
 0x2e1   : > { %v855_v47 = vsel %vm669_vm5, %v852_v31, %v854_v45  ;;  %v856_v10 = vsel %vm669_vm5, %v854_v45, %v852_v31 }
 0x2e2   : > { %v857_v52 = vmul.f32 %v855_v47, %v1694_v5  ;;  %v858_v53 = vmul.f32 %v856_v10, %v1667_v49  ;;  %1031 = vmatprep.subr.bf16.mxu0 %v886_v46  ;;  %v1215_v46 = vld [vmem:[%s2008_s12] sm:$0xff] }
 0x2e3   : > { %v860_v55 = vpop.permute.xlu1 %859  ;;  %1032 = vmatpush1.bf16.msra.mxu0 %v885_v39  ;;  %v1223_v47 = vld [vmem:[%s2009_s13] sm:$0xff] }
 0x2e4   : > { %v887_v56 = vpack.c.bf16 %v857_v52, %v849_v51  ;;  %v862_v57 = vpop.permute.xlu0 %861  ;;  %v888_v58 = vpack.c.bf16 %v858_v53, %v850_v54 }
 0x2e5   : > { %v863_v61 = vsel %vm686_vm6, %v860_v55, %v862_v57  ;;  %v864_v2 = vsel %vm686_vm6, %v862_v57, %v860_v55 }
 0x2e6   : > { %1033 = vmatprep.subr.bf16.mxu0 %v888_v58  ;;  %v865_v0 = vmul.f32 %v863_v61, %v1712_v26  ;;  %v866_v4 = vmul.f32 %v864_v2, %v1715_v24 }
 0x2e7   : > { %v868_v62 = vpop.permute.xlu1 %867  ;;  %1034 = vmatpush1.bf16.msra.mxu0 %v887_v56 }
 0x2e8   : > { %v870_v1 = vpop.permute.xlu0 %869 }
 0x2e9   : > { %v871_v3 = vsel %vm703_vm7, %v868_v62, %v870_v1  ;;  %v872_v63 = vsel %vm703_vm7, %v870_v1, %v868_v62 }
 0x2ea   : > { %v873_v6 = vmul.f32 %v871_v3, %v1719_v28  ;;  %v874_v7 = vmul.f32 %v872_v63, %v1722_v29 }
 0x2eb   : > { %v876_v8 = vpop.permute.xlu1 %875 }
 0x2ec   : > { %v889_v9 = vpack.c.bf16 %v873_v6, %v865_v0  ;;  %v878_v12 = vpop.permute.xlu0 %877  ;;  %v890_v13 = vpack.c.bf16 %v874_v7, %v866_v4 }
 0x2ed   : > { %v879_v16 = vsel %vm720_vm8, %v876_v8, %v878_v12  ;;  %v880_v17 = vsel %vm720_vm8, %v878_v12, %v876_v8 }
 0x2ee   : > { %v881_v14 = vmul.f32 %v1742_v48, %v879_v16  ;;  %v882_v15 = vmul.f32 %v1747_v50, %v880_v17  ;;  %1035 = vmatprep.subr.bf16.mxu0 %v890_v13 }
 0x2ef   : > { %1036 = vmatpush1.bf16.msra.mxu0 %v889_v9 }
 0x2f0   : > { %v891_v20 = vpack.c.bf16 %v881_v14, %v881_v14  ;;  %v892_v19 = vpack.c.bf16 %v882_v15, %v882_v15 }
 0x2f2   : > { %1327 = vmatprep.subr.msk.bf16.mxu0 %vm747_vm9, %v892_v19  ;;  %v1024_v21 = vsel %vm747_vm9, %v891_v20, 0 }
 0x2f3   : > { %1038 = vmatpush1.bf16.msra.mxu0 %v1024_v21 }
 0x2f6   : > { %1328 = vmatmul.mubr.msk.bf16.vlgmr.msra.gmra.mrb[4].mxu0 %vm743_vm10, %v816_v22 }
 0x2fc   : > { %v1074_v25 = vpop.permute.xlu1 %1073 }
 0x2fd   : > { %v1082_v34 = vpop.permute.xlu0 %1081 }
 0x3c9   : > { %v1063_v27 = vpop.f32.mrb[4].mxu0 }
 0x3ca   : > { %v1076_v32 = vmul.f32 %v1074_v25, %v1063_v27  ;;  %v1065_v11 = vpop.f32.mrb[5].mxu0 }
 0x3cb   : > { %v1077_v35 = vmul.f32 %v1074_v25, %v1065_v11  ;;  %v1067_v36 = vpop.f32.mrb[6].mxu0 }
 0x3cc   : > { %v1084_v38 = vadd.f32 %v1082_v34, %v1076_v32  ;;  %v1068_v30 = vpop.f32.mrb[7].mxu0 }
 0x3cd   : > { %v1085_v31 = vadd.f32 %v1082_v34, %v1077_v35 }
 0x3ce   : > { %v1086_v39 = vmax.f32 %v1084_v38, 0.0 }
 0x3cf   : > { %v1087_v45 = vmax.f32 %v1085_v31, 0.0 }
 0x3d0   : > { %1089 = vrot.lane.b32.xlu1 %v1086_v39, %s1420_s22  ;;  %v1121_v19 = vmul.f32 %v1086_v39, %v1705_v18 }
 0x3d1   : > { %1091 = vrot.lane.b32.xlu0 %v1087_v45, %s1420_s22 }
 0x3d4   : > { %1097 = vrot.lane.b32.xlu1 %v1086_v39, %s1419_s21 }
 0x3d5   : > { %1099 = vrot.lane.b32.xlu0 %v1087_v45, %s1419_s21 }
 0x3d8   : > { %1105 = vrot.lane.b32.xlu1 %v1086_v39, %s1421_s23 }
 0x3d9   : > { %1107 = vrot.lane.b32.xlu0 %v1087_v45, %s1421_s23 }
 0x3dc   : > { %1113 = vrot.lane.b32.xlu1 %v1086_v39, %s1422_s24 }
 0x3dd   : > { %1115 = vrot.lane.b32.xlu0 %v1087_v45, %s1422_s24 }
 0x3e0   : > { %1123 = vrot.lane.b32.xlu1 %v1086_v39, %s1423_s25 }
 0x3e1   : > { %1125 = vrot.lane.b32.xlu0 %v1087_v45, %s1423_s25 }
 0x3e4   : > { %1131 = vrot.lane.b32.xlu1 %v1086_v39, %s1424_s27 }
 0x3e5   : > { %1133 = vrot.lane.b32.xlu0 %v1087_v45, %s1424_s27 }
 0x3e8   : > { %1139 = vrot.lane.b32.xlu1 %v1086_v39, %s1425_s17 }
 0x3e9   : > { %1141 = vrot.lane.b32.xlu0 %v1087_v45, %s1425_s17  ;;  %s1334_s17 = sshll.u32 %s2012_s30, 4 }
 0x3ea   : > { %s484_s16 = scalar_lea.vmem %s2010_s14, %s1334_s17 }
 0x3ec   : > { %1147 = vrot.lane.b32.xlu1 %v1086_v39, %s1426_s18 }
 0x3ed   : > { %1149 = vrot.lane.b32.xlu0 %v1087_v45, %s1426_s18 }
 0x3f0   : > { %1218 = vperm.xlu1 %1357, %v1215_v46  }
 0x3f1   : > { %1226 = vperm.xlu0 %1356, %v1223_v47  }
 0x442   : > { %v1090_v10 = vpop.permute.xlu1 %1089 }
 0x443   : > { %v1092_v51 = vpop.permute.xlu0 %1091 }
 0x444   : > { %v1093_v52 = vsel %vm591_vm4, %v1090_v10, %v1092_v51  ;;  %v1094_v53 = vsel %vm591_vm4, %v1092_v51, %v1090_v10  ;;  %v1088_v10 = vld [vmem:[%s2007_s11] sm:$0xf] }
 0x445   : > { %v1095_v58 = vmul.f32 %v1094_v53, %v1652_v41  ;;  %v1096_v61 = vmul.f32 %v1093_v52, %v1655_v42 }
 0x446   : > { %v1098_v54 = vpop.permute.xlu1 %1097 }
 0x447   : > { %v1100_v55 = vpop.permute.xlu0 %1099 }
 0x448   : > { %v1101_v56 = vsel %vm608_vm1, %v1098_v54, %v1100_v55  ;;  %v1102_v57 = vsel %vm608_vm1, %v1100_v55, %v1098_v54 }
 0x449   : > { %v1103_v2 = vmul.f32 %v1102_v57, %v1635_v33  ;;  %v1104_v62 = vmul.f32 %v1101_v56, %v1639_v37 }
 0x44a   : > { %v1106_v1 = vpop.permute.xlu1 %1105 }
 0x44b   : > { %v1155_v3 = vpack.c.bf16 %v1103_v2, %v1095_v58  ;;  %v1108_v63 = vpop.permute.xlu0 %1107  ;;  %v1156_v0 = vpack.c.bf16 %v1104_v62, %v1096_v61 }
 0x44c   : > { %v1109_v4 = vsel %vm625_vm2, %v1106_v1, %v1108_v63  ;;  %v1110_v6 = vsel %vm625_vm2, %v1108_v63, %v1106_v1 }
 0x44d   : > { %1174 = vmatprep.subr.bf16.mxu1 %v1156_v0  ;;  %v1111_v37 = vmul.f32 %v1110_v6, %v1684_v59  ;;  %v1112_v8 = vmul.f32 %v1109_v4, %v1658_v43 }
 0x44e   : > { %v1114_v7 = vpop.permute.xlu1 %1113  ;;  %1175 = vmatpush1.bf16.msra.mxu1 %v1155_v3 }
 0x44f   : > { %v1116_v41 = vpop.permute.xlu0 %1115 }
 0x450   : > { %v1117_v42 = vsel %vm642_vm3, %v1114_v7, %v1116_v41  ;;  %v1118_v33 = vsel %vm642_vm3, %v1116_v41, %v1114_v7 }
 0x451   : > { %v1119_v9 = vmul.f32 %v1118_v33, %v1661_v44  ;;  %v1120_v12 = vmul.f32 %v1117_v42, %v1648_v40  ;;  %v1122_v44 = vmul.f32 %v1087_v45, %v1687_v60 }
 0x452   : > { %v1124_v13 = vpop.permute.xlu1 %1123 }
 0x453   : > { %v1157_v16 = vpack.c.bf16 %v1119_v9, %v1111_v37  ;;  %v1126_v17 = vpop.permute.xlu0 %1125  ;;  %v1158_v14 = vpack.c.bf16 %v1120_v12, %v1112_v8 }
 0x454   : > { %v1127_v15 = vsel %vm669_vm5, %v1124_v13, %v1126_v17  ;;  %v1128_v20 = vsel %vm669_vm5, %v1126_v17, %v1124_v13 }
 0x455   : > { %v1129_v59 = vmul.f32 %v1127_v15, %v1694_v5  ;;  %v1130_v43 = vmul.f32 %v1128_v20, %v1667_v49  ;;  %1176 = vmatprep.subr.bf16.mxu1 %v1158_v14 }
 0x456   : > { %v1132_v40 = vpop.permute.xlu1 %1131  ;;  %1177 = vmatpush1.bf16.msra.mxu1 %v1157_v16 }
 0x457   : > { %v1159_v21 = vpack.c.bf16 %v1129_v59, %v1121_v19  ;;  %v1134_v22 = vpop.permute.xlu0 %1133  ;;  %v1160_v25 = vpack.c.bf16 %v1130_v43, %v1122_v44 }
 0x458   : > { %v1135_v27 = vsel %vm686_vm6, %v1132_v40, %v1134_v22  ;;  %v1136_v32 = vsel %vm686_vm6, %v1134_v22, %v1132_v40 }
 0x459   : > { %1178 = vmatprep.subr.bf16.mxu1 %v1160_v25  ;;  %v1137_v11 = vmul.f32 %v1135_v27, %v1712_v26  ;;  %v1138_v34 = vmul.f32 %v1136_v32, %v1715_v24 }
 0x45a   : > { %v1140_v18 = vpop.permute.xlu1 %1139  ;;  %1179 = vmatpush1.bf16.msra.mxu1 %v1159_v21 }
 0x45b   : > { %v1142_v5 = vpop.permute.xlu0 %1141 }
 0x45c   : > { %v1143_v49 = vsel %vm703_vm7, %v1140_v18, %v1142_v5  ;;  %v1144_v60 = vsel %vm703_vm7, %v1142_v5, %v1140_v18 }
 0x45d   : > { %v1145_v35 = vmul.f32 %v1143_v49, %v1719_v28  ;;  %v1146_v36 = vmul.f32 %v1144_v60, %v1722_v29 }
 0x45e   : > { %v1148_v38 = vpop.permute.xlu1 %1147 }
 0x45f   : > { %v1161_v30 = vpack.c.bf16 %v1145_v35, %v1137_v11  ;;  %v1150_v31 = vpop.permute.xlu0 %1149  ;;  %v1162_v39 = vpack.c.bf16 %v1146_v36, %v1138_v34 }
 0x460   : > { %v1151_v45 = vsel %vm720_vm8, %v1148_v38, %v1150_v31  ;;  %v1152_v46 = vsel %vm720_vm8, %v1150_v31, %v1148_v38 }
 0x461   : > { %v1153_v47 = vmul.f32 %v1742_v48, %v1151_v45  ;;  %v1154_v26 = vmul.f32 %v1747_v50, %v1152_v46  ;;  %1180 = vmatprep.subr.bf16.mxu1 %v1162_v39 }
 0x462   : > { %1181 = vmatpush1.bf16.msra.mxu1 %v1161_v30 }
 0x463   : > { %v1163_v24 = vpack.c.bf16 %v1153_v47, %v1153_v47  ;;  %v1164_v28 = vpack.c.bf16 %v1154_v26, %v1154_v26 }
 0x465   : > { %1329 = vmatprep.subr.msk.bf16.mxu1 %vm747_vm9, %v1164_v28  ;;  %v1169_v29 = vsel %vm747_vm9, %v1163_v24, 0 }
 0x466   : > { %1183 = vmatpush1.bf16.msra.mxu1 %v1169_v29 }
 0x469   : > { %1330 = vmatmul.mubr.msk.bf16.vlgmr.msra.gmra.mrb[4].mxu1 %vm743_vm10, %v1088_v10 }
 0x46f   : > { %v1219_v23 = vpop.permute.xlu1 %1218 }
 0x470   : > { %v1227_v52 = vpop.permute.xlu0 %1226 }
 0x53c   : > { %v1208_v51 = vpop.f32.mrb[4].mxu1 }
 0x53d   : > { %v1221_v48 = vmul.f32 %v1219_v23, %v1208_v51  ;;  %v1210_v50 = vpop.f32.mrb[5].mxu1 }
 0x53e   : > { %v1222_v53 = vmul.f32 %v1219_v23, %v1210_v50  ;;  %v1212_v54 = vpop.f32.mrb[6].mxu1 }
 0x53f   : > { %v1229_v55 = vadd.f32 %v1227_v52, %v1221_v48  ;;  %v1213_v56 = vpop.f32.mrb[7].mxu1 }
 0x540   : > { %v1230_v57 = vadd.f32 %v1227_v52, %v1222_v53 }
 0x541   : > { %v1231_v58 = vmax.f32 %v1229_v55, 0.0 }
 0x542   : > { %v1232_v61 = vmax.f32 %v1230_v57, 0.0 }
 0x543   : > { %1233 = vst [vmem:[%s484_s16] sm:$0xff] %v1231_v58 }
 0x544   : > { %1234 = vst [vmem:[%s484_s16 + $0x8] sm:$0xff] %v1232_v61 }
 0x545 PF: > { %s24_s29 = sadd.s32 1, %s1416_s29  }
 0x546   : > { %p21_p4 = scmp.ge.s32.totalorder %s24_s29, 4  }
 0x548   :  { %23 = sbr.rel (!%p21_p4) target bundleno = 1 (0x1), region = 109 }

</bundles_post_ra>
